<compile_context>
chip_gen: v7x
topology: tpu7x:2x2x1
jax: 0.10.0
libtpu: 0.0.40
codegen_flags: <defaults>
</compile_context>

<pallas_src>
import jax
import jax.numpy as jnp
from jax.experimental import pallas as pl
from jax.experimental.pallas import tpu as pltpu


def _patch_embed_kernel(p_ref, w_ref, b_ref, o_ref):
    # p_ref: (TM, PP) compute_dtype   w_ref: (PP, Ep) compute_dtype
    # b_ref: (1, Ep)  float32         o_ref: (TM, Ep) out_dtype
    acc = jnp.dot(p_ref[...], w_ref[...], preferred_element_type=jnp.float32)
    o_ref[...] = (acc + b_ref[...]).astype(o_ref.dtype)     # add stays f32


def _round_down(x, m):
    return (x // m) * m


def _tpu_vmem_capacity_bytes():
    """Best-effort query of per-core VMEM capacity; defaults to v5e/v6e 128 MiB."""
    try:
        info = pltpu.get_tpu_info()
        cap = getattr(info, "vmem_capacity_bytes", None)
        if cap:
            return int(cap)
    except Exception:
        pass
    return 128 << 20


def _pick_tile_m(M, tm_cap, two_tc):
    """Largest MXU-aligned row tile that fits the VMEM cap (divides nothing —
    partial final blocks are handled by Pallas)."""
    if M < 8:
        return M
    tm = max(8, min(M, tm_cap))
    if tm < M:
        if tm >= 256:
            tm = _round_down(tm, 256)
        elif tm >= 128:
            tm = _round_down(tm, 128)
        else:
            tm = _round_down(tm, 8)
    # v7x has 2 TensorCores sharing the "parallel" grid axis: prefer >=2 grid
    # steps, but only when each step still carries a 256-aligned M tile.
    if two_tc and tm >= M and M >= 512:
        tm = _round_down(-(-M // 2), 256)
    return max(8, min(tm, M))


def embed_layer(x, conv_w, conv_b, cls_token, pos_embedding, patch_size,
                *, compute_dtype=jnp.bfloat16, out_dtype=None):
    """x: (B, 1, H, W).  Returns (B, N+1, E) in out_dtype (default x.dtype)."""
    B, C, H, W = x.shape
    assert C == 1
    P = patch_size
    E = conv_w.shape[0]
    Nh, Nw = H // P, W // P
    N = Nh * Nw
    PP = P * P
    M = B * N
    out_dtype = x.dtype if out_dtype is None else jnp.dtype(out_dtype)

    # Lane-dense output: pad the embedding axis to a multiple of 128 so kernel
    # stores are unmasked (no-op at real ViT widths; 32 -> 128 at toy scale).
    Ep = E if E % 128 == 0 else ((E + 127) // 128) * 128

    # --- patchify in XLA: one fused transpose+cast pass over the image -------
    # TODO(synk): fuse patch extraction into the kernel to drop this HBM pass.
    patches = x.reshape(B, Nh, P, Nw, P).transpose(0, 1, 3, 2, 4)
    patches = patches.reshape(M, PP).astype(compute_dtype)   # bf16 at boundary

    w_flat = conv_w.reshape(E, PP).T.astype(compute_dtype)   # (PP, E)
    bias = conv_b.reshape(1, E).astype(jnp.float32)          # f32 elementwise add
    if Ep != E:
        w_flat = jnp.pad(w_flat, ((0, 0), (0, Ep - E)))
        bias = jnp.pad(bias, ((0, 0), (0, Ep - E)))

    # --- generation-aware tile selection --------------------------------------
    vmem_cap = _tpu_vmem_capacity_bytes()
    vmem_limit = int(min(vmem_cap * 3 // 4, 96 << 20))   # ~48 MiB v7x, 96 MiB v5e/v6e
    vmem_budget = int(vmem_limit * 0.8)
    in_item = jnp.dtype(compute_dtype).itemsize
    out_item = jnp.dtype(out_dtype).itemsize
    # Per output-row VMEM bytes: double-buffered patch row + double-buffered
    # output row + f32 matmul accumulator / add intermediate (x2 headroom).
    per_row = PP * in_item * 2 + Ep * out_item * 2 + Ep * 4 * 2
    fixed = (PP * Ep * in_item + Ep * 4) * 2              # weights + bias (x2 buf)
    tm_cap = max(8, (vmem_budget - fixed) // per_row)
    two_tc = vmem_cap <= (64 << 20)                       # v7x-like chip heuristic
    TM = _pick_tile_m(M, tm_cap, two_tc)
    grid = (pl.cdiv(M, TM),)

    emb = pl.pallas_call(
        _patch_embed_kernel,
        out_shape=jax.ShapeDtypeStruct((M, Ep), out_dtype),
        grid_spec=pltpu.PrefetchScalarGridSpec(
            num_scalar_prefetch=0,
            grid=grid,
            in_specs=[
                pl.BlockSpec((TM, PP), lambda m: (m, 0)),
                pl.BlockSpec((PP, Ep), lambda m: (0, 0)),
                pl.BlockSpec((1, Ep), lambda m: (0, 0)),
            ],
            out_specs=pl.BlockSpec((TM, Ep), lambda m: (m, 0)),
        ),
        compiler_params=pltpu.CompilerParams(
            dimension_semantics=("parallel",),
            vmem_limit_bytes=vmem_limit),
    )(patches, w_flat, bias)

    # --- cls token + positional embedding -------------------------------------
    # The concat pass over the output exists regardless (cls row is prepended);
    # XLA fuses the pos add and the lane-pad slice into that same pass, so this
    # costs no extra HBM traffic vs. doing the add in-kernel.
    emb = emb[:, :E].reshape(B, N, E)
    pos = pos_embedding.reshape(N + 1, E)
    body = emb + pos[1:]
    cls_rows = jnp.broadcast_to(
        (cls_token.reshape(1, E) + pos[:1])[None].astype(body.dtype), (B, 1, E))
    return jnp.concatenate([cls_rows, body], axis=1).astype(out_dtype)


def embed_layer_reference(x, conv_w, conv_b, cls_token, pos_embedding, patch_size):
    """Pure-JAX reference using an actual conv (independent of the patchify path)."""
    B = x.shape[0]
    E = conv_w.shape[0]
    y = jax.lax.conv_general_dilated(
        x, conv_w, window_strides=(patch_size, patch_size), padding="VALID",
        dimension_numbers=("NCHW", "OIHW", "NCHW"))        # (B, E, Nh, Nw)
    y = y + conv_b[None, :, None, None]
    y = y.reshape(B, E, -1).transpose(0, 2, 1)             # (B, N, E)
    cls = jnp.broadcast_to(cls_token.reshape(1, 1, E), (B, 1, E))
    y = jnp.concatenate([cls, y], axis=1) + pos_embedding.reshape(1, -1, E)
    return y


if __name__ == "__main__":
    # args
    img_size = 16
    patch_size = 4
    embed_dim = 32
    B = 2
    N = (img_size // patch_size) ** 2  # 16

    key = jax.random.PRNGKey(0)
    kx, kw, kb, kc, kp = jax.random.split(key, 5)

    x = jax.random.normal(kx, (B, 1, img_size, img_size), dtype=jnp.float32)
    conv_w = 0.1 * jax.random.normal(kw, (embed_dim, 1, patch_size, patch_size),
                                     dtype=jnp.float32)
    conv_b = 0.1 * jax.random.normal(kb, (embed_dim,), dtype=jnp.float32)
    # PyTorch inits cls_token / pos_embedding to zeros; use small random values
    # so the additions are actually exercised (deterministic via PRNGKey(0)).
    cls_token = 0.02 * jax.random.normal(kc, (1, 1, embed_dim), dtype=jnp.float32)
    pos_embedding = 0.02 * jax.random.normal(kp, (1, N + 1, embed_dim),
                                             dtype=jnp.float32)

    ref = embed_layer_reference(x, conv_w, conv_b, cls_token, pos_embedding,
                                patch_size)

    run = jax.jit(embed_layer,
                  static_argnames=("patch_size", "compute_dtype", "out_dtype"))

    # f32 MXU-operand path: tight check against the conv reference.
    out_f32 = jax.block_until_ready(
        run(x, conv_w, conv_b, cls_token, pos_embedding,
            patch_size=patch_size, compute_dtype=jnp.float32))
    assert out_f32.shape == (B, N + 1, embed_dim), out_f32.shape
    assert jnp.allclose(out_f32, ref, atol=1e-5, rtol=1e-5), float(
        jnp.max(jnp.abs(out_f32 - ref)))

    # Default bf16 MXU-operand path (fast path on v6e/v7x, f32 accumulate).
    out_bf16 = jax.block_until_ready(
        run(x, conv_w, conv_b, cls_token, pos_embedding, patch_size=patch_size))
    assert out_bf16.shape == (B, N + 1, embed_dim), out_bf16.shape
    assert jnp.allclose(out_bf16, ref, atol=2e-2, rtol=2e-2), float(
        jnp.max(jnp.abs(out_bf16 - ref)))

    print("KERNEL_OK")
</pallas_src>

<mosaic_0001>
module attributes {stable_mosaic.version = 11 : i64} {
  func.func @_patch_embed_kernel(%arg0: i32, %arg1: memref<32x16xf32, #tpu.memory_space<vmem>>, %arg2: memref<16x128xf32, #tpu.memory_space<vmem>>, %arg3: memref<1x128xf32, #tpu.memory_space<vmem>>, %arg4: memref<32x128xf32, #tpu.memory_space<vmem>>) attributes {dimension_semantics = [#tpu.dimension_semantics<parallel>], iteration_bounds = array<i64: 1>, scalar_prefetch = 0 : i64, scratch_operands = 0 : i64, tpu.core_type = #tpu.core_type<tc>, window_params = [{transform_indices = @transform_0, window_bounds = array<i64: 32, 16>}, {pipeline_mode = #tpu.pipeline_mode<synchronous>, transform_indices = @transform_1, window_bounds = array<i64: 16, 128>}, {pipeline_mode = #tpu.pipeline_mode<synchronous>, transform_indices = @transform_2, window_bounds = array<i64: 1, 128>}, {transform_indices = @transform_3, window_bounds = array<i64: 32, 128>}]} {
    %c0 = arith.constant 0 : index
    %c0_0 = arith.constant 0 : index
    %0 = vector.load %arg1[%c0, %c0_0] : memref<32x16xf32, #tpu.memory_space<vmem>>, vector<32x16xf32>
    %c0_1 = arith.constant 0 : index
    %c0_2 = arith.constant 0 : index
    %1 = vector.load %arg2[%c0_1, %c0_2] : memref<16x128xf32, #tpu.memory_space<vmem>>, vector<16x128xf32>
    %cst = arith.constant dense<0.000000e+00> : vector<32x128xf32>
    %2 = tpu.matmul %0, %1, %cst {dimension_numbers = #tpu.dot_dimension_numbers<[1], [0], [0], [1], [0, 0, 1, 1], [], []>} : vector<32x16xf32>, vector<16x128xf32>, vector<32x128xf32> -> vector<32x128xf32>
    %c0_3 = arith.constant 0 : index
    %c0_4 = arith.constant 0 : index
    %3 = vector.load %arg3[%c0_3, %c0_4] : memref<1x128xf32, #tpu.memory_space<vmem>>, vector<1x128xf32>
    %4 = vector.broadcast %3 : vector<1x128xf32> to vector<32x128xf32>
    %5 = arith.addf %2, %4 : vector<32x128xf32>
    %c0_5 = arith.constant 0 : index
    %c0_6 = arith.constant 0 : index
    %6 = vector.load %arg4[%c0_5, %c0_6] : memref<32x128xf32, #tpu.memory_space<vmem>>, vector<32x128xf32>
    tpu.vector_store %arg4[%c0_5, %c0_6], %5 {strides = array<i32>} : memref<32x128xf32, #tpu.memory_space<vmem>>, vector<32x128xf32>,
    return
  }
  func.func @transform_0(%arg0: i32) -> (i32, i32) {
    %c0_i32 = arith.constant 0 : i32
    %c0_i32_0 = arith.constant 0 : i32
    return %arg0, %c0_i32 : i32, i32
  }
  func.func @transform_1(%arg0: i32) -> (i32, i32) {
    %c0_i32 = arith.constant 0 : i32
    %c0_i32_0 = arith.constant 0 : i32
    %c0_i32_1 = arith.constant 0 : i32
    return %c0_i32, %c0_i32_0 : i32, i32
  }
  func.func @transform_2(%arg0: i32) -> (i32, i32) {
    %c0_i32 = arith.constant 0 : i32
    %c0_i32_0 = arith.constant 0 : i32
    %c0_i32_1 = arith.constant 0 : i32
    return %c0_i32, %c0_i32_0 : i32, i32
  }
  func.func @transform_3(%arg0: i32) -> (i32, i32) {
    %c0_i32 = arith.constant 0 : i32
    %c0_i32_0 = arith.constant 0 : i32
    return %arg0, %c0_i32 : i32, i32
  }
}

</mosaic_0001>

<bundles_post_ra>
// kernel: embed_layer.1
= control target key start
LH: loop header
LB: loop body
LE: loop exit
PB: predicated region body
PF: predicated region fallthrough
CT: control target
= control target key end

     0   :  { %8 = vsyncpa [#allocation3], 0  ;;  %s404_s0 = inlined_call_operand.hbm [shape: f32[32,16], index: 0, kind: input, shape index: {}]   ;;  %s405_s1 = inlined_call_operand.hbm [shape: f32[16,128], index: 1, kind: input, shape index: {}]   ;;  %s406_s2 = inlined_call_operand.hbm [shape: f32[1,128], index: 2, kind: input, shape index: {}]   ;;  %s407_s3 = inlined_call_operand.hbm [shape: f32[32,128], index: 3, kind: output, shape index: {}]  }
   0x1   :  { %9 = vsyncpa [#allocation6], 0 }
   0x2   :  { %10 = vsyncpa [#allocation4], 0  ;;  %s314_s12 = smov [#allocation5]   ;;  %s315_s14 = smov [#allocation2]  }
   0x3   :  { %s28_s13 = sshll.u32 %s314_s12, 4  ;;  %s16_s15 = sshll.u32 %s315_s14, 4  ;;  %s29_s13 = int_to_ptr.vmem [resolvable:$true] %s28_s13  ;;  %s340_s15 = int_to_ptr.vmem [resolvable:$true] %s16_s15 }
   0x4   :  { %s220_s18 = scalar_lea.hbm %s405_s1, 256 }
   0x5   :  { %p221_p0 = scmp.ne.s32.totalorder %s405_s1, %s220_s18  ;;  %p224_p1 = scmp.lt.u32.totalorder %s220_s18, %s405_s1 }
   0x7   :  { %p226_p2 = pnand %p224_p1, %p221_p0 }
   0x9   :  { %229 = shalt.err (!%p226_p2)
}
   0xa   :  { %s230_s23 = scalar_lea.vmem %s29_s13, 256  ;;  %p235_p4 = scmp.lt.s32.totalorder %s29_s13, %s29_s13 }
   0xb   :  { %p231_p3 = scmp.ne.s32.totalorder %s29_s13, %s230_s23  ;;  %p236_p5 = scmp.lt.s32.totalorder %s230_s23, %s230_s23 }
   0xd   :  { %p237_p6 = por %p236_p5, %p235_p4 }
   0xf   :  { %p238_p7 = pnand %p237_p6, %p231_p3 }
  0x11   :  { %241 = shalt.err (!%p238_p7)
}
  0x12   :  { %s316_s24 = smov 128   ;;  %s317_s25 = smov 8  }
  0x13   :  { %34 = dma.hbm_to_vmem [thread:$0]  %s405_s1, 256, %s29_s13, [#allocation6], %s316_s24, %s316_s24, %s317_s25  }
  0x14   :  { %s242_s30 = scalar_lea.hbm %s404_s0, 512 }
  0x15   :  { %p243_p8 = scmp.ne.s32.totalorder %s404_s0, %s242_s30  ;;  %p246_p9 = scmp.lt.u32.totalorder %s242_s30, %s404_s0 }
  0x17   :  { %p248_p10 = pnand %p246_p9, %p243_p8 }
  0x19   :  { %251 = shalt.err (!%p248_p10)
}
  0x1a   :  { %s252_s8 = scalar_lea.vmem %s340_s15, 512  ;;  %p257_p12 = scmp.lt.s32.totalorder %s340_s15, %s340_s15 }
  0x1b   :  { %p253_p11 = scmp.ne.s32.totalorder %s340_s15, %s252_s8  ;;  %p258_p13 = scmp.lt.s32.totalorder %s252_s8, %s252_s8 }
  0x1d   :  { %p259_p0 = por %p258_p13, %p257_p12 }
  0x1f   :  { %p260_p1 = pnand %p259_p0, %p253_p11 }
  0x21   :  { %263 = shalt.err (!%p260_p1)
}
  0x22   :  { %22 = dma.hbm_to_vmem [thread:$0]  %s404_s0, 512, %s340_s15, [#allocation3], %s316_s24, %s316_s24, %s317_s25  }
  0x23   :  { %s318_s10 = smov [#allocation7]   ;;  %s264_s14 = scalar_lea.hbm %s406_s2, 16 }
  0x24   :  { %s41_s11 = sshll.u32 %s318_s10, 4  ;;  %p265_p2 = scmp.ne.s32.totalorder %s406_s2, %s264_s14  ;;  %s42_s11 = int_to_ptr.vmem [resolvable:$true] %s41_s11 }
  0x25   :  { %p268_p3 = scmp.lt.u32.totalorder %s264_s14, %s406_s2 }
  0x27   :  { %p270_p4 = pnand %p268_p3, %p265_p2 }
  0x29   :  { %273 = shalt.err (!%p270_p4)
}
  0x2a   :  { %s274_s20 = scalar_lea.vmem %s42_s11, 16  ;;  %s278_s0 = scalar_lea.vmem %s42_s11, 32 }
  0x2b   :  { %p275_p5 = scmp.ne.s32.totalorder %s42_s11, %s274_s20  ;;  %p279_p6 = scmp.lt.s32.totalorder %s42_s11, %s42_s11 }
  0x2c   :  { %p280_p7 = scmp.lt.s32.totalorder %s278_s0, %s274_s20 }
  0x2e   :  { %p281_p8 = por %p280_p7, %p279_p6 }
  0x30   :  { %p282_p9 = pnand %p281_p8, %p275_p5 }
  0x32   :  { %285 = shalt.err (!%p282_p9)
}
  0x33   :  { %44 = dma.hbm_to_vmem [thread:$0]  %s406_s2, 16, %s42_s11, [#allocation6]  }
  0x34   :  { %308 = dma.done.wait [#allocation3], 512  }
  0x35   :  { %309 = vsyncadd [#allocation3], 4294966784 }
  0x36   :  { %310 = dma.done.wait [#allocation6], 272  }
  0x37   :  { %311 = vsyncadd [#allocation6], 4294967024  ;;  %vm67_vm0 = vcmask 130048   ;;  %v58_v0 = vld [vmem:[#allocation5] sm:$0xff]  ;;  %v59_v1 = vld [vmem:[#allocation5 + $0x8] sm:$0xff]  ;;  %s319_s2 = smov [#allocation8]  }
  0x38   :  { %v54_v2 = vld [vmem:[#allocation2] sm:$0xff]  ;;  %v208_v3 = vpack.c.bf16 %v59_v1, %v58_v0  ;;  %v56_v4 = vld [vmem:[#allocation2 + $0x10] sm:$0xff]  ;;  %v55_v5 = vld [vmem:[#allocation2 + $0x8] sm:$0xff]  ;;  %s174_s22 = sshll.u32 %s319_s2, 4  ;;  %s175_s22 = int_to_ptr.vmem [resolvable:$true] %s174_s22 }
  0x39   :  { %202 = vmatprep.mubr.msk.f32.mxu0 %vm67_vm0, %v54_v2  ;;  %205 = vmatprep.mubr.msk.f32.mxu1 %vm67_vm0, %v56_v4  ;;  %v57_v6 = vld [vmem:[#allocation2 + $0x18] sm:$0xff]  ;;  %v187_v7 = vld [vmem:[#allocation7] ss:$0 sm:$0xff]  ;;  %s286_s23 = scalar_lea.vmem %s175_s22, 512  ;;  %p291_p11 = scmp.lt.s32.totalorder %s175_s22, %s175_s22 }
  0x3a   :  { %209 = vmatprep.subr.bf16.mxu0 %v208_v3  ;;  %212 = vmatprep.subr.bf16.mxu1 %v208_v3  ;;  %p287_p10 = scmp.ne.s32.totalorder %s175_s22, %s286_s23  ;;  %p292_p12 = scmp.lt.s32.totalorder %s286_s23, %s286_s23 }
  0x3b   :  { %211 = vmatpush3.bf16.msra.mxu0 %v208_v3  ;;  %213 = vmatpush3.bf16.msra.mxu1 %v208_v3 }
  0x3c   :  { %p293_p13 = por %p292_p12, %p291_p11 }
  0x3e   :  { %203 = vmatmul.mubr.msk.f32.vlgmr.msra.gmra.mrb[0].mxu0 %vm67_vm0, %v55_v5  ;;  %206 = vmatmul.mubr.msk.f32.vlgmr.msra.gmra.mrb[0].mxu1 %vm67_vm0, %v57_v6  ;;  %p294_p0 = pnand %p293_p13, %p287_p10 }
 0x111   :  { %v204_v8 = vpop.f32.mrb[0].mxu0  ;;  %v207_v9 = vpop.f32.mrb[0].mxu1 }
 0x112   :  { %v152_v10 = vadd.f32 %v204_v8, %v187_v7  ;;  %v162_v11 = vadd.f32 %v207_v9, %v187_v7  ;;  %v146_v12 = vpop.f32.mrb[1].mxu0  ;;  %v156_v13 = vpop.f32.mrb[1].mxu1 }
 0x113   :  { %v147_v14 = vadd.f32 %v187_v7, %v146_v12  ;;  %v157_v15 = vadd.f32 %v187_v7, %v156_v13 }
 0x114   :  { %166 = vst [vmem:[#allocation8 + $0x8] sm:$0xff] %v152_v10  ;;  %168 = vst [vmem:[#allocation8 + $0x18] sm:$0xff] %v162_v11 }
 0x115   :  { %165 = vst [vmem:[#allocation8] sm:$0xff] %v147_v14  ;;  %167 = vst [vmem:[#allocation8 + $0x10] sm:$0xff] %v157_v15 }
 0x116   :  { %297 = shalt.err (!%p294_p0)
}
 0x117   :  { %s298_s28 = scalar_lea.hbm %s407_s3, 512 }
 0x118   :  { %p299_p1 = scmp.ne.s32.totalorder %s407_s3, %s298_s28  ;;  %p302_p2 = scmp.lt.u32.totalorder %s298_s28, %s407_s3 }
 0x11a   :  { %p304_p3 = pnand %p302_p2, %p299_p1 }
 0x11c   :  { %307 = shalt.err (!%p304_p3)
}
 0x11d   :  { %180 = dma.vmem_to_hbm [thread:$0]  %s175_s22, 512, %s407_s3, [#allocation4], %s316_s24, %s316_s24, %s317_s25  }
 0x11e   :  { %312 = dma.done.wait [#allocation4], 512  }
 0x11f   :  { %313 = vsyncadd [#allocation4], 4294966784 }
 0x120   :  { %184 = vsyncpa [#allocation3], 1 }
 0x121   :  { %185 = vsyncpa [#allocation6], 1 }
 0x122   :  { %186 = vsyncpa [#allocation4], 1 }

</bundles_post_ra>
